<compile_context>
chip_gen: v7x
topology: tpu7x:2x2x1
jax: 0.10.0
libtpu: 0.0.40
codegen_flags: <defaults>
</compile_context>

<pallas_src>
import functools

import numpy as np
import jax
import jax.numpy as jnp
from jax.experimental import pallas as pl
from jax.experimental.pallas import tpu as pltpu


def _round_up(x, m):
    return (x + m - 1) // m * m


# -----------------------------------------------------------------------------
# Static configuration (pure Python; mirrors PyTorch's output-size arithmetic).
# -----------------------------------------------------------------------------
def build_config(n, in_channel, w_in, filter_num, filter_size, strides,
                 pool_strides):
    n_stages = len(filter_num)
    tb = n if n <= 8 else 8                      # examples per grid block
    assert n % tb == 0, "batch must be divisible by the batch tile"

    stride_prod = 1
    for s in list(strides) + list(pool_strides):
        stride_prod *= int(s)
    w_blk0 = _round_up(w_in, stride_prod)        # per-example lane stride
    c_pad = _round_up(max([in_channel] + list(filter_num)), 8)
    l_blk = _round_up(tb * w_blk0, 128)          # lanes per grid block
    k_max = max(filter_size)
    lw = max(128, l_blk, k_max * c_pad + 8)      # lane width of the param pack

    stages = []
    w_valid, w_blk, cin = w_in, w_blk0, in_channel
    for cout, k, cs, ps in zip(filter_num, filter_size, strides, pool_strides):
        w_valid = (w_valid - k) // cs + 1        # Conv2d((1,k), stride=cs)
        assert w_valid > 0 and w_blk % cs == 0
        w_blk //= cs
        w_valid = (w_valid - k) // ps + 1        # MaxPool2d((1,k), stride=ps)
        assert w_valid > 0 and w_blk % ps == 0
        w_blk //= ps
        assert w_valid <= w_blk
        stages.append(dict(k=k, cin=cin, cout=cout, conv_stride=cs,
                           pool_k=k, pool_stride=ps))
        cin = cout

    row_sel = n_stages * c_pad                   # AdaptiveAvgPool selection rows
    row_wl = row_sel + 8                         # Linear weight (transposed)
    row_bl = row_wl + 2                          # Linear bias
    r_pack = _round_up(row_bl + 1, 8)

    return dict(n=n, tb=tb, cin0=in_channel, w_in=w_in, w_blk0=w_blk0,
                c_pad=c_pad, c_last=cin, l_blk=l_blk, lw=lw, stages=stages,
                w_blk_final=w_blk, w_valid_final=w_valid,
                row_sel=row_sel, row_wl=row_wl, row_bl=row_bl, r_pack=r_pack)


# -----------------------------------------------------------------------------
# One-time host-side parameter packing -> a single (r_pack, lw) f32 input.
#   rows [si*c_pad, si*c_pad+c_pad): cols [0, k*c_pad) = W^T (im2col layout),
#     col lw-3 = conv bias, lw-2 = BN scale, lw-1 = BN shift
#   rows [row_sel, row_sel+tb): block-local AdaptiveAvgPool mean-selection rows
#   rows [row_wl, row_wl+2): Linear weight transposed (2, c_last)
#   row   row_bl, cols 0:2 : Linear bias
# -----------------------------------------------------------------------------
def pack_parameters(params, wl, bl, cfg):
    c_pad, lw, tb = cfg["c_pad"], cfg["lw"], cfg["tb"]
    pk = np.zeros((cfg["r_pack"], lw), np.float32)
    for si, ((w, b, scale, shift), st) in enumerate(zip(params, cfg["stages"])):
        k, cin, cout = st["k"], st["cin"], st["cout"]
        r0 = si * c_pad
        w_np = np.asarray(w, np.float32)                      # (k, cin, cout)
        for j in range(k):
            pk[r0:r0 + cout, j * c_pad:j * c_pad + cin] = w_np[j].T
        pk[r0:r0 + cout, lw - 3] = np.asarray(b, np.float32)
        pk[r0:r0 + cout, lw - 2] = np.asarray(scale, np.float32)
        pk[r0:r0 + cout, lw - 1] = np.asarray(shift, np.float32)
    # AdaptiveAvgPool2d((1,1)): per-example masked-mean rows (static, hoisted).
    wbf, wvf = cfg["w_blk_final"], cfg["w_valid_final"]
    for t in range(tb):
        pk[cfg["row_sel"] + t, t * wbf:t * wbf + wvf] = 1.0 / wvf
    pk[cfg["row_wl"]:cfg["row_wl"] + 2, 0:cfg["c_last"]] = \
        np.asarray(wl, np.float32).T                          # (2, c_last)
    pk[cfg["row_bl"], 0:2] = np.asarray(bl, np.float32)
    return jnp.asarray(pk)


# -----------------------------------------------------------------------------
# Lane down-select for conv/pool strides > 1 (block-local, O(l^2) per grid block
# -- constant in batch size).  Not traced when all strides are 1 (demo config).
# -----------------------------------------------------------------------------
def _lane_downselect(v, stride, w_blk_old, tb, l):
    w_new = w_blk_old // stride
    src = jax.lax.broadcasted_iota(jnp.int32, (l, l), 0)
    dst = jax.lax.broadcasted_iota(jnp.int32, (l, l), 1)
    t = dst // w_new
    i = dst - t * w_new
    keep = (t < tb) & (src == t * w_blk_old + i * stride)
    sel = keep.astype(jnp.float32)
    out = jnp.dot(v.astype(jnp.bfloat16), sel.astype(jnp.bfloat16),
                  preferred_element_type=jnp.float32)
    return out, w_new


# -----------------------------------------------------------------------------
# Fused kernel: TB examples per grid step, everything VMEM/vreg-resident.
# Activations: (c_pad sublanes, l_blk lanes); example t occupies lanes
# [t*w_blk, t*w_blk + w_valid); all other lanes hold finite don't-care values
# that are never read by valid positions and are masked out by the head.
# -----------------------------------------------------------------------------
def fused_cnn_kernel(x_ref, p_ref, o_ref, abuf, *, cfg):
    c_pad, tb = cfg["c_pad"], cfg["tb"]
    l_blk, lw = cfg["l_blk"], cfg["lw"]
    cin0, w_in, w_blk = cfg["cin0"], cfg["w_in"], cfg["w_blk0"]

    # --- Assemble the lane-dense layout in VMEM scratch (in-kernel layout prep).
    abuf[...] = jnp.zeros_like(abuf)
    xv = x_ref[...]                                      # (tb*cin0, w_in)
    for t in range(tb):
        abuf[0:cin0, t * w_blk:t * w_blk + w_in] = xv[t * cin0:(t + 1) * cin0, :]
    act = abuf[...]                                      # (c_pad, l_blk) f32

    def roll_left(v, j):                                 # lane rotation (XLU slot)
        return v if j == 0 else pltpu.roll(v, shift=l_blk - j, axis=1)

    for si, st in enumerate(cfg["stages"]):
        k, cs = st["k"], st["conv_stride"]
        pool_k, ps = st["pool_k"], st["pool_stride"]
        r0 = si * c_pad
        wt = p_ref[r0:r0 + c_pad, 0:k * c_pad].astype(jnp.bfloat16)
        bias = p_ref[r0:r0 + c_pad, lw - 3:lw - 2]       # (c_pad, 1)
        scale = p_ref[r0:r0 + c_pad, lw - 2:lw - 1]
        shift = p_ref[r0:r0 + c_pad, lw - 1:lw]

        # Conv2d(cin->cout, (1,k)) as ONE matmul over the whole batch block:
        # k lane-rolled taps stacked on sublanes (8-aligned), bf16 operands.
        col = jnp.concatenate([roll_left(act, j) for j in range(k)], axis=0)
        y = jnp.dot(wt, col.astype(jnp.bfloat16),
                    preferred_element_type=jnp.float32)  # (c_pad, l_blk)
        y = jnp.maximum(y + bias, 0.0)                   # bias + ReLU
        if cs > 1:                                       # dead code when stride == 1
            y, w_blk = _lane_downselect(y, cs, w_blk, tb, l_blk)

        # MaxPool2d((1, pool_k), pool_stride) via lane rolls.
        pooled = y
        for j in range(1, pool_k):
            pooled = jnp.maximum(pooled, roll_left(y, j))
        if ps > 1:
            pooled, w_blk = _lane_downselect(pooled, ps, w_blk, tb, l_blk)

        # BatchNorm2d (inference) folded affine; Dropout = identity.
        act = pooled * scale + shift

    # --- Head: AdaptiveAvgPool2d((1,1)) via precomputed block-local selection
    # rows (hoisted to host), then Linear(c_last -> 2), exact Sigmoid.
    sel = p_ref[cfg["row_sel"]:cfg["row_sel"] + tb, 0:l_blk]   # (tb, l_blk)
    wl_t = p_ref[cfg["row_wl"]:cfg["row_wl"] + 2, 0:c_pad]     # (2, c_pad)
    bl = p_ref[cfg["row_bl"]:cfg["row_bl"] + 1, 0:2]           # (1, 2)

    pooled_tc = jax.lax.dot_general(                           # (tb, c_pad)
        sel.astype(jnp.bfloat16), act.astype(jnp.bfloat16),
        (((1,), (1,)), ((), ())), preferred_element_type=jnp.float32)
    logits = jax.lax.dot_general(                              # (tb, 2)
        pooled_tc.astype(jnp.bfloat16), wl_t.astype(jnp.bfloat16),
        (((1,), (1,)), ((), ())), preferred_element_type=jnp.float32)
    logits = logits + bl
    o_ref[...] = 1.0 / (1.0 + jnp.exp(-logits))                # exact sigmoid


# -----------------------------------------------------------------------------
# Wrapper factory: packs parameters once, returns a jitted forward(x).
# -----------------------------------------------------------------------------
def make_cnn_forward(params, wl, bl, in_channel, filter_size, strides,
                     pool_strides, n, w_in):
    filter_num = [int(np.asarray(p[0]).shape[2]) for p in params]
    cfg = build_config(n, in_channel, w_in, filter_num, filter_size, strides,
                       pool_strides)
    pack = pack_parameters(params, wl, bl, cfg)   # single packed param input
    tb, cin0 = cfg["tb"], cfg["cin0"]
    assert tb == n or (tb * cin0) % 8 == 0

    call = pl.pallas_call(
        functools.partial(fused_cnn_kernel, cfg=cfg),
        out_shape=jax.ShapeDtypeStruct((n, 2), jnp.float32),
        grid=(n // tb,),
        in_specs=[
            # x as (N*C, W): block of TB examples per grid step.
            pl.BlockSpec((tb * cin0, w_in), lambda i: (i, 0)),
            # Packed parameters: same block every step -> stays VMEM-resident.
            pl.BlockSpec((cfg["r_pack"], cfg["lw"]), lambda i: (0, 0)),
        ],
        out_specs=pl.BlockSpec((tb, 2), lambda i: (i, 0)),
        scratch_shapes=[pltpu.VMEM((cfg["c_pad"], cfg["l_blk"]), jnp.float32)],
        compiler_params=pltpu.CompilerParams(
            dimension_semantics=("parallel",)),
    )

    @jax.jit
    def forward(x_nchw):
        # Only a free contiguity-preserving reshape (no transpose / pad / extra
        # HBM round trip); the lane-dense layout is built inside the kernel.
        x2d = x_nchw.astype(jnp.float32).reshape(n * in_channel, w_in)
        return call(x2d, pack)

    return forward


# -----------------------------------------------------------------------------
# Deterministic synthetic parameters (BN running stats folded to scale/shift).
# Conv weight convention: (k, cin, cout).
# -----------------------------------------------------------------------------
def init_params(key, in_channel, filter_num, filter_size, eps=1e-5):
    params = []
    cin = in_channel
    for cout, k in zip(filter_num, filter_size):
        key, kw, kb, kg, kbe, km, kv = jax.random.split(key, 7)
        w = 0.1 * jax.random.normal(kw, (k, cin, cout), jnp.float32)
        b = 0.1 * jax.random.normal(kb, (cout,), jnp.float32)
        gamma = 1.0 + 0.1 * jax.random.normal(kg, (cout,), jnp.float32)
        beta = 0.1 * jax.random.normal(kbe, (cout,), jnp.float32)
        mean = 0.1 * jax.random.normal(km, (cout,), jnp.float32)
        var = 0.5 + 0.1 * jnp.abs(jax.random.normal(kv, (cout,), jnp.float32))
        inv_std = 1.0 / jnp.sqrt(var + eps)
        params.append((w, b, gamma * inv_std, beta - mean * gamma * inv_std))
        cin = cout
    key, kwl, kbl = jax.random.split(key, 3)
    wl = 0.1 * jax.random.normal(kwl, (cin, 2), jnp.float32)
    bl = 0.1 * jax.random.normal(kbl, (2,), jnp.float32)
    return params, wl, bl


if __name__ == "__main__":
    # Module hyperparameters (small, consistent with the __init__ signature).
    in_channel = 4
    filter_num = [8, 8, 8, 8, 8, 8]
    filter_size = [2, 2, 2, 2, 2, 2]
    strides = [1, 1, 1, 1, 1, 1]
    pool_strides = [1, 1, 1, 1, 1, 1]
    dropout_para = [0.1, 0.1, 0.1]     # eval mode -> identity (unused)

    n, w_in = 2, 16
    key = jax.random.PRNGKey(0)
    key, kx = jax.random.split(key)
    x = jax.random.normal(kx, (n, in_channel, 1, w_in), jnp.float32)  # NCHW, H=1

    params, wl, bl = init_params(key, in_channel, filter_num, filter_size)
    forward = make_cnn_forward(params, wl, bl, in_channel, filter_size,
                               strides, pool_strides, n, w_in)
    out = jax.block_until_ready(forward(x))
    assert out.shape == (n, 2) and out.dtype == jnp.float32
    assert bool(jnp.all(jnp.isfinite(out)))
    assert bool(jnp.all((out > 0.0) & (out < 1.0)))   # sigmoid range
    print("KERNEL_OK")
</pallas_src>

<mosaic_0001>
module attributes {stable_mosaic.version = 11 : i64} {
  func.func @fused_cnn_kernel(%arg0: i32, %arg1: memref<8x16xf32, #tpu.memory_space<vmem>>, %arg2: memref<64x128xf32, #tpu.memory_space<vmem>>, %arg3: memref<2x2xf32, #tpu.memory_space<vmem>>, %arg4: memref<8x128xf32, #tpu.memory_space<vmem>>) attributes {dimension_semantics = [#tpu.dimension_semantics<parallel>], iteration_bounds = array<i64: 1>, scalar_prefetch = 0 : i64, scratch_operands = 1 : i64, tpu.core_type = #tpu.core_type<tc>, window_params = [{transform_indices = @transform_0, window_bounds = array<i64: 8, 16>}, {pipeline_mode = #tpu.pipeline_mode<synchronous>, transform_indices = @transform_1, window_bounds = array<i64: 64, 128>}, {transform_indices = @transform_2, window_bounds = array<i64: 2, 2>}]} {
    %cst = arith.constant 0.000000e+00 : f32
    %0 = vector.broadcast %cst : f32 to vector<8x128xf32>
    %c0 = arith.constant 0 : index
    %c0_0 = arith.constant 0 : index
    %1 = vector.load %arg4[%c0, %c0_0] : memref<8x128xf32, #tpu.memory_space<vmem>>, vector<8x128xf32>
    tpu.vector_store %arg4[%c0, %c0_0], %0 {strides = array<i32>} : memref<8x128xf32, #tpu.memory_space<vmem>>, vector<8x128xf32>,
    %c0_1 = arith.constant 0 : index
    %c0_2 = arith.constant 0 : index
    %2 = vector.load %arg1[%c0_1, %c0_2] : memref<8x16xf32, #tpu.memory_space<vmem>>, vector<8x16xf32>
    %3 = vector.extract_strided_slice %2 {offsets = [0, 0], sizes = [4, 16], strides = [1, 1]} : vector<8x16xf32> to vector<4x16xf32>
    %c0_3 = arith.constant 0 : index
    %c0_4 = arith.constant 0 : index
    %4 = vector.load %arg4[%c0_3, %c0_4] : memref<8x128xf32, #tpu.memory_space<vmem>>, vector<4x16xf32>
    tpu.vector_store %arg4[%c0_3, %c0_4], %3 {strides = array<i32>} : memref<8x128xf32, #tpu.memory_space<vmem>>, vector<4x16xf32>,
    %5 = vector.extract_strided_slice %2 {offsets = [4, 0], sizes = [4, 16], strides = [1, 1]} : vector<8x16xf32> to vector<4x16xf32>
    %c0_5 = arith.constant 0 : index
    %c16 = arith.constant 16 : index
    %6 = vector.load %arg4[%c0_5, %c16] : memref<8x128xf32, #tpu.memory_space<vmem>>, vector<4x16xf32>
    tpu.vector_store %arg4[%c0_5, %c16], %5 {strides = array<i32>} : memref<8x128xf32, #tpu.memory_space<vmem>>, vector<4x16xf32>,
    %c0_6 = arith.constant 0 : index
    %c0_7 = arith.constant 0 : index
    %7 = vector.load %arg4[%c0_6, %c0_7] : memref<8x128xf32, #tpu.memory_space<vmem>>, vector<8x128xf32>
    %c0_8 = arith.constant 0 : index
    %c0_9 = arith.constant 0 : index
    %8 = vector.load %arg2[%c0_8, %c0_9] : memref<64x128xf32, #tpu.memory_space<vmem>>, vector<8x16xf32>
    %9 = arith.truncf %8 : vector<8x16xf32> to vector<8x16xbf16>
    %c0_10 = arith.constant 0 : index
    %c125 = arith.constant 125 : index
    %10 = vector.load %arg2[%c0_10, %c125] : memref<64x128xf32, #tpu.memory_space<vmem>>, vector<8x1xf32>
    %c0_11 = arith.constant 0 : index
    %c126 = arith.constant 126 : index
    %11 = vector.load %arg2[%c0_11, %c126] : memref<64x128xf32, #tpu.memory_space<vmem>>, vector<8x1xf32>
    %c0_12 = arith.constant 0 : index
    %c127 = arith.constant 127 : index
    %12 = vector.load %arg2[%c0_12, %c127] : memref<64x128xf32, #tpu.memory_space<vmem>>, vector<8x1xf32>
    %c127_i32 = arith.constant 127 : i32
    %13 = tpu.dynamic_rotate %7 by %c127_i32 dim 1 : vector<8x128xf32>, i32 -> vector<8x128xf32>
    %14 = tpu.concatenate %7, %13 in 0 : vector<8x128xf32>, vector<8x128xf32> -> vector<16x128xf32>
    %15 = arith.truncf %14 : vector<16x128xf32> to vector<16x128xbf16>
    %cst_13 = arith.constant dense<0.000000e+00> : vector<8x128xf32>
    %16 = tpu.matmul %9, %15, %cst_13 {dimension_numbers = #tpu.dot_dimension_numbers<[1], [0], [0], [1], [0, 0, 1, 1], [], []>} : vector<8x16xbf16>, vector<16x128xbf16>, vector<8x128xf32> -> vector<8x128xf32>
    %17 = vector.broadcast %10 : vector<8x1xf32> to vector<8x128xf32>
    %18 = arith.addf %16, %17 : vector<8x128xf32>
    %cst_14 = arith.constant 0.000000e+00 : f32
    %19 = vector.broadcast %cst_14 : f32 to vector<8x128xf32>
    %20 = arith.maximumf %18, %19 : vector<8x128xf32>
    %c127_i32_15 = arith.constant 127 : i32
    %21 = tpu.dynamic_rotate %20 by %c127_i32_15 dim 1 : vector<8x128xf32>, i32 -> vector<8x128xf32>
    %22 = arith.maximumf %20, %21 : vector<8x128xf32>
    %23 = vector.broadcast %11 : vector<8x1xf32> to vector<8x128xf32>
    %24 = arith.mulf %22, %23 : vector<8x128xf32>
    %25 = vector.broadcast %12 : vector<8x1xf32> to vector<8x128xf32>
    %26 = arith.addf %24, %25 : vector<8x128xf32>
    %c8 = arith.constant 8 : index
    %c0_16 = arith.constant 0 : index
    %27 = vector.load %arg2[%c8, %c0_16] : memref<64x128xf32, #tpu.memory_space<vmem>>, vector<8x16xf32>
    %28 = arith.truncf %27 : vector<8x16xf32> to vector<8x16xbf16>
    %c8_17 = arith.constant 8 : index
    %c125_18 = arith.constant 125 : index
    %29 = vector.load %arg2[%c8_17, %c125_18] : memref<64x128xf32, #tpu.memory_space<vmem>>, vector<8x1xf32>
    %c8_19 = arith.constant 8 : index
    %c126_20 = arith.constant 126 : index
    %30 = vector.load %arg2[%c8_19, %c126_20] : memref<64x128xf32, #tpu.memory_space<vmem>>, vector<8x1xf32>
    %c8_21 = arith.constant 8 : index
    %c127_22 = arith.constant 127 : index
    %31 = vector.load %arg2[%c8_21, %c127_22] : memref<64x128xf32, #tpu.memory_space<vmem>>, vector<8x1xf32>
    %c127_i32_23 = arith.constant 127 : i32
    %32 = tpu.dynamic_rotate %26 by %c127_i32_23 dim 1 : vector<8x128xf32>, i32 -> vector<8x128xf32>
    %33 = tpu.concatenate %26, %32 in 0 : vector<8x128xf32>, vector<8x128xf32> -> vector<16x128xf32>
    %34 = arith.truncf %33 : vector<16x128xf32> to vector<16x128xbf16>
    %cst_24 = arith.constant dense<0.000000e+00> : vector<8x128xf32>
    %35 = tpu.matmul %28, %34, %cst_24 {dimension_numbers = #tpu.dot_dimension_numbers<[1], [0], [0], [1], [0, 0, 1, 1], [], []>} : vector<8x16xbf16>, vector<16x128xbf16>, vector<8x128xf32> -> vector<8x128xf32>
    %36 = vector.broadcast %29 : vector<8x1xf32> to vector<8x128xf32>
    %37 = arith.addf %35, %36 : vector<8x128xf32>
    %cst_25 = arith.constant 0.000000e+00 : f32
    %38 = vector.broadcast %cst_25 : f32 to vector<8x128xf32>
    %39 = arith.maximumf %37, %38 : vector<8x128xf32>
    %c127_i32_26 = arith.constant 127 : i32
    %40 = tpu.dynamic_rotate %39 by %c127_i32_26 dim 1 : vector<8x128xf32>, i32 -> vector<8x128xf32>
    %41 = arith.maximumf %39, %40 : vector<8x128xf32>
    %42 = vector.broadcast %30 : vector<8x1xf32> to vector<8x128xf32>
    %43 = arith.mulf %41, %42 : vector<8x128xf32>
    %44 = vector.broadcast %31 : vector<8x1xf32> to vector<8x128xf32>
    %45 = arith.addf %43, %44 : vector<8x128xf32>
    %c16_27 = arith.constant 16 : index
    %c0_28 = arith.constant 0 : index
    %46 = vector.load %arg2[%c16_27, %c0_28] : memref<64x128xf32, #tpu.memory_space<vmem>>, vector<8x16xf32>
    %47 = arith.truncf %46 : vector<8x16xf32> to vector<8x16xbf16>
    %c16_29 = arith.constant 16 : index
    %c125_30 = arith.constant 125 : index
    %48 = vector.load %arg2[%c16_29, %c125_30] : memref<64x128xf32, #tpu.memory_space<vmem>>, vector<8x1xf32>
    %c16_31 = arith.constant 16 : index
    %c126_32 = arith.constant 126 : index
    %49 = vector.load %arg2[%c16_31, %c126_32] : memref<64x128xf32, #tpu.memory_space<vmem>>, vector<8x1xf32>
    %c16_33 = arith.constant 16 : index
    %c127_34 = arith.constant 127 : index
    %50 = vector.load %arg2[%c16_33, %c127_34] : memref<64x128xf32, #tpu.memory_space<vmem>>, vector<8x1xf32>
    %c127_i32_35 = arith.constant 127 : i32
    %51 = tpu.dynamic_rotate %45 by %c127_i32_35 dim 1 : vector<8x128xf32>, i32 -> vector<8x128xf32>
    %52 = tpu.concatenate %45, %51 in 0 : vector<8x128xf32>, vector<8x128xf32> -> vector<16x128xf32>
    %53 = arith.truncf %52 : vector<16x128xf32> to vector<16x128xbf16>
    %cst_36 = arith.constant dense<0.000000e+00> : vector<8x128xf32>
    %54 = tpu.matmul %47, %53, %cst_36 {dimension_numbers = #tpu.dot_dimension_numbers<[1], [0], [0], [1], [0, 0, 1, 1], [], []>} : vector<8x16xbf16>, vector<16x128xbf16>, vector<8x128xf32> -> vector<8x128xf32>
    %55 = vector.broadcast %48 : vector<8x1xf32> to vector<8x128xf32>
    %56 = arith.addf %54, %55 : vector<8x128xf32>
    %cst_37 = arith.constant 0.000000e+00 : f32
    %57 = vector.broadcast %cst_37 : f32 to vector<8x128xf32>
    %58 = arith.maximumf %56, %57 : vector<8x128xf32>
    %c127_i32_38 = arith.constant 127 : i32
    %59 = tpu.dynamic_rotate %58 by %c127_i32_38 dim 1 : vector<8x128xf32>, i32 -> vector<8x128xf32>
    %60 = arith.maximumf %58, %59 : vector<8x128xf32>
    %61 = vector.broadcast %49 : vector<8x1xf32> to vector<8x128xf32>
    %62 = arith.mulf %60, %61 : vector<8x128xf32>
    %63 = vector.broadcast %50 : vector<8x1xf32> to vector<8x128xf32>
    %64 = arith.addf %62, %63 : vector<8x128xf32>
    %c24 = arith.constant 24 : index
    %c0_39 = arith.constant 0 : index
    %65 = vector.load %arg2[%c24, %c0_39] : memref<64x128xf32, #tpu.memory_space<vmem>>, vector<8x16xf32>
    %66 = arith.truncf %65 : vector<8x16xf32> to vector<8x16xbf16>
    %c24_40 = arith.constant 24 : index
    %c125_41 = arith.constant 125 : index
    %67 = vector.load %arg2[%c24_40, %c125_41] : memref<64x128xf32, #tpu.memory_space<vmem>>, vector<8x1xf32>
    %c24_42 = arith.constant 24 : index
    %c126_43 = arith.constant 126 : index
    %68 = vector.load %arg2[%c24_42, %c126_43] : memref<64x128xf32, #tpu.memory_space<vmem>>, vector<8x1xf32>
    %c24_44 = arith.constant 24 : index
    %c127_45 = arith.constant 127 : index
    %69 = vector.load %arg2[%c24_44, %c127_45] : memref<64x128xf32, #tpu.memory_space<vmem>>, vector<8x1xf32>
    %c127_i32_46 = arith.constant 127 : i32
    %70 = tpu.dynamic_rotate %64 by %c127_i32_46 dim 1 : vector<8x128xf32>, i32 -> vector<8x128xf32>
    %71 = tpu.concatenate %64, %70 in 0 : vector<8x128xf32>, vector<8x128xf32> -> vector<16x128xf32>
    %72 = arith.truncf %71 : vector<16x128xf32> to vector<16x128xbf16>
    %cst_47 = arith.constant dense<0.000000e+00> : vector<8x128xf32>
    %73 = tpu.matmul %66, %72, %cst_47 {dimension_numbers = #tpu.dot_dimension_numbers<[1], [0], [0], [1], [0, 0, 1, 1], [], []>} : vector<8x16xbf16>, vector<16x128xbf16>, vector<8x128xf32> -> vector<8x128xf32>
    %74 = vector.broadcast %67 : vector<8x1xf32> to vector<8x128xf32>
    %75 = arith.addf %73, %74 : vector<8x128xf32>
    %cst_48 = arith.constant 0.000000e+00 : f32
    %76 = vector.broadcast %cst_48 : f32 to vector<8x128xf32>
    %77 = arith.maximumf %75, %76 : vector<8x128xf32>
    %c127_i32_49 = arith.constant 127 : i32
    %78 = tpu.dynamic_rotate %77 by %c127_i32_49 dim 1 : vector<8x128xf32>, i32 -> vector<8x128xf32>
    %79 = arith.maximumf %77, %78 : vector<8x128xf32>
    %80 = vector.broadcast %68 : vector<8x1xf32> to vector<8x128xf32>
    %81 = arith.mulf %79, %80 : vector<8x128xf32>
    %82 = vector.broadcast %69 : vector<8x1xf32> to vector<8x128xf32>
    %83 = arith.addf %81, %82 : vector<8x128xf32>
    %c32 = arith.constant 32 : index
    %c0_50 = arith.constant 0 : index
    %84 = vector.load %arg2[%c32, %c0_50] : memref<64x128xf32, #tpu.memory_space<vmem>>, vector<8x16xf32>
    %85 = arith.truncf %84 : vector<8x16xf32> to vector<8x16xbf16>
    %c32_51 = arith.constant 32 : index
    %c125_52 = arith.constant 125 : index
    %86 = vector.load %arg2[%c32_51, %c125_52] : memref<64x128xf32, #tpu.memory_space<vmem>>, vector<8x1xf32>
    %c32_53 = arith.constant 32 : index
    %c126_54 = arith.constant 126 : index
    %87 = vector.load %arg2[%c32_53, %c126_54] : memref<64x128xf32, #tpu.memory_space<vmem>>, vector<8x1xf32>
    %c32_55 = arith.constant 32 : index
    %c127_56 = arith.constant 127 : index
    %88 = vector.load %arg2[%c32_55, %c127_56] : memref<64x128xf32, #tpu.memory_space<vmem>>, vector<8x1xf32>
    %c127_i32_57 = arith.constant 127 : i32
    %89 = tpu.dynamic_rotate %83 by %c127_i32_57 dim 1 : vector<8x128xf32>, i32 -> vector<8x128xf32>
    %90 = tpu.concatenate %83, %89 in 0 : vector<8x128xf32>, vector<8x128xf32> -> vector<16x128xf32>
    %91 = arith.truncf %90 : vector<16x128xf32> to vector<16x128xbf16>
    %cst_58 = arith.constant dense<0.000000e+00> : vector<8x128xf32>
    %92 = tpu.matmul %85, %91, %cst_58 {dimension_numbers = #tpu.dot_dimension_numbers<[1], [0], [0], [1], [0, 0, 1, 1], [], []>} : vector<8x16xbf16>, vector<16x128xbf16>, vector<8x128xf32> -> vector<8x128xf32>
    %93 = vector.broadcast %86 : vector<8x1xf32> to vector<8x128xf32>
    %94 = arith.addf %92, %93 : vector<8x128xf32>
    %cst_59 = arith.constant 0.000000e+00 : f32
    %95 = vector.broadcast %cst_59 : f32 to vector<8x128xf32>
    %96 = arith.maximumf %94, %95 : vector<8x128xf32>
    %c127_i32_60 = arith.constant 127 : i32
    %97 = tpu.dynamic_rotate %96 by %c127_i32_60 dim 1 : vector<8x128xf32>, i32 -> vector<8x128xf32>
    %98 = arith.maximumf %96, %97 : vector<8x128xf32>
    %99 = vector.broadcast %87 : vector<8x1xf32> to vector<8x128xf32>
    %100 = arith.mulf %98, %99 : vector<8x128xf32>
    %101 = vector.broadcast %88 : vector<8x1xf32> to vector<8x128xf32>
    %102 = arith.addf %100, %101 : vector<8x128xf32>
    %c40 = arith.constant 40 : index
    %c0_61 = arith.constant 0 : index
    %103 = vector.load %arg2[%c40, %c0_61] : memref<64x128xf32, #tpu.memory_space<vmem>>, vector<8x16xf32>
    %104 = arith.truncf %103 : vector<8x16xf32> to vector<8x16xbf16>
    %c40_62 = arith.constant 40 : index
    %c125_63 = arith.constant 125 : index
    %105 = vector.load %arg2[%c40_62, %c125_63] : memref<64x128xf32, #tpu.memory_space<vmem>>, vector<8x1xf32>
    %c40_64 = arith.constant 40 : index
    %c126_65 = arith.constant 126 : index
    %106 = vector.load %arg2[%c40_64, %c126_65] : memref<64x128xf32, #tpu.memory_space<vmem>>, vector<8x1xf32>
    %c40_66 = arith.constant 40 : index
    %c127_67 = arith.constant 127 : index
    %107 = vector.load %arg2[%c40_66, %c127_67] : memref<64x128xf32, #tpu.memory_space<vmem>>, vector<8x1xf32>
    %c127_i32_68 = arith.constant 127 : i32
    %108 = tpu.dynamic_rotate %102 by %c127_i32_68 dim 1 : vector<8x128xf32>, i32 -> vector<8x128xf32>
    %109 = tpu.concatenate %102, %108 in 0 : vector<8x128xf32>, vector<8x128xf32> -> vector<16x128xf32>
    %110 = arith.truncf %109 : vector<16x128xf32> to vector<16x128xbf16>
    %cst_69 = arith.constant dense<0.000000e+00> : vector<8x128xf32>
    %111 = tpu.matmul %104, %110, %cst_69 {dimension_numbers = #tpu.dot_dimension_numbers<[1], [0], [0], [1], [0, 0, 1, 1], [], []>} : vector<8x16xbf16>, vector<16x128xbf16>, vector<8x128xf32> -> vector<8x128xf32>
    %112 = vector.broadcast %105 : vector<8x1xf32> to vector<8x128xf32>
    %113 = arith.addf %111, %112 : vector<8x128xf32>
    %cst_70 = arith.constant 0.000000e+00 : f32
    %114 = vector.broadcast %cst_70 : f32 to vector<8x128xf32>
    %115 = arith.maximumf %113, %114 : vector<8x128xf32>
    %c127_i32_71 = arith.constant 127 : i32
    %116 = tpu.dynamic_rotate %115 by %c127_i32_71 dim 1 : vector<8x128xf32>, i32 -> vector<8x128xf32>
    %117 = arith.maximumf %115, %116 : vector<8x128xf32>
    %118 = vector.broadcast %106 : vector<8x1xf32> to vector<8x128xf32>
    %119 = arith.mulf %117, %118 : vector<8x128xf32>
    %120 = vector.broadcast %107 : vector<8x1xf32> to vector<8x128xf32>
    %121 = arith.addf %119, %120 : vector<8x128xf32>
    %c48 = arith.constant 48 : index
    %c0_72 = arith.constant 0 : index
    %122 = vector.load %arg2[%c48, %c0_72] : memref<64x128xf32, #tpu.memory_space<vmem>>, vector<2x128xf32>
    %c56 = arith.constant 56 : index
    %c0_73 = arith.constant 0 : index
    %123 = vector.load %arg2[%c56, %c0_73] : memref<64x128xf32, #tpu.memory_space<vmem>>, vector<2x8xf32>
    %c58 = arith.constant 58 : index
    %c0_74 = arith.constant 0 : index
    %124 = vector.load %arg2[%c58, %c0_74] : memref<64x128xf32, #tpu.memory_space<vmem>>, vector<1x2xf32>
    %125 = arith.truncf %122 : vector<2x128xf32> to vector<2x128xbf16>
    %126 = arith.truncf %121 : vector<8x128xf32> to vector<8x128xbf16>
    %cst_75 = arith.constant dense<0.000000e+00> : vector<2x8xf32>
    %127 = tpu.matmul %125, %126, %cst_75 {dimension_numbers = #tpu.dot_dimension_numbers<[1], [1], [0], [0], [0, 0, 1, 0], [], []>} : vector<2x128xbf16>, vector<8x128xbf16>, vector<2x8xf32> -> vector<2x8xf32>
    %128 = arith.truncf %127 : vector<2x8xf32> to vector<2x8xbf16>
    %129 = arith.truncf %123 : vector<2x8xf32> to vector<2x8xbf16>
    %cst_76 = arith.constant dense<0.000000e+00> : vector<2x2xf32>
    %130 = tpu.matmul %128, %129, %cst_76 {dimension_numbers = #tpu.dot_dimension_numbers<[1], [1], [0], [0], [0, 0, 1, 0], [], []>} : vector<2x8xbf16>, vector<2x8xbf16>, vector<2x2xf32> -> vector<2x2xf32>
    %131 = vector.broadcast %124 : vector<1x2xf32> to vector<2x2xf32>
    %132 = arith.addf %130, %131 : vector<2x2xf32>
    %cst_77 = arith.constant 0.000000e+00 : f32
    %133 = vector.broadcast %cst_77 : f32 to vector<2x2xf32>
    %134 = arith.subf %133, %132 : vector<2x2xf32>
    %135 = math.exp %134 : vector<2x2xf32>
    %cst_78 = arith.constant 1.000000e+00 : f32
    %136 = vector.broadcast %cst_78 : f32 to vector<2x2xf32>
    %137 = arith.addf %136, %135 : vector<2x2xf32>
    %cst_79 = arith.constant 1.000000e+00 : f32
    %138 = vector.broadcast %cst_79 : f32 to vector<2x2xf32>
    %139 = arith.divf %138, %137 : vector<2x2xf32>
    %c0_80 = arith.constant 0 : index
    %c0_81 = arith.constant 0 : index
    %140 = vector.load %arg3[%c0_80, %c0_81] : memref<2x2xf32, #tpu.memory_space<vmem>>, vector<2x2xf32>
    tpu.vector_store %arg3[%c0_80, %c0_81], %139 {strides = array<i32>} : memref<2x2xf32, #tpu.memory_space<vmem>>, vector<2x2xf32>,
    return
  }
  func.func @transform_0(%arg0: i32) -> (i32, i32) {
    %c0_i32 = arith.constant 0 : i32
    %c0_i32_0 = arith.constant 0 : i32
    return %arg0, %c0_i32 : i32, i32
  }
  func.func @transform_1(%arg0: i32) -> (i32, i32) {
    %c0_i32 = arith.constant 0 : i32
    %c0_i32_0 = arith.constant 0 : i32
    %c0_i32_1 = arith.constant 0 : i32
    return %c0_i32, %c0_i32_0 : i32, i32
  }
  func.func @transform_2(%arg0: i32) -> (i32, i32) {
    %c0_i32 = arith.constant 0 : i32
    %c0_i32_0 = arith.constant 0 : i32
    return %arg0, %c0_i32 : i32, i32
  }
}

</mosaic_0001>

<bundles_post_ra>
// kernel: forward.1
= control target key start
LH: loop header
LB: loop body
LE: loop exit
PB: predicated region body
PF: predicated region fallthrough
CT: control target
= control target key end

     0   :  { %7 = vsyncpa [#allocation4], 0  ;;  %s878_s0 = inlined_call_operand.hbm [shape: f32[8,16], index: 0, kind: input, shape index: {}]   ;;  %s879_s1 = inlined_call_operand.hbm [shape: f32[64,128], index: 1, kind: input, shape index: {}]   ;;  %s880_s2 = inlined_call_operand.hbm [shape: f32[2,2], index: 2, kind: output, shape index: {}]  }
   0x1   :  { %8 = vsyncpa [#allocation7], 0 }
   0x2   :  { %9 = vsyncpa [#allocation5], 0  ;;  %s749_s9 = smov [#allocation3]   ;;  %s750_s11 = smov [#allocation6]  }
   0x3   :  { %s16_s10 = sshll.u32 %s749_s9, 4  ;;  %s25_s12 = sshll.u32 %s750_s11, 4  ;;  %s17_s10 = int_to_ptr.vmem [resolvable:$true] %s16_s10  ;;  %s776_s12 = int_to_ptr.vmem [resolvable:$true] %s25_s12 }
   0x4   :  { %s677_s15 = scalar_lea.hbm %s878_s0, 128 }
   0x5   :  { %p678_p0 = scmp.ne.s32.totalorder %s878_s0, %s677_s15  ;;  %p681_p1 = scmp.lt.u32.totalorder %s677_s15, %s878_s0 }
   0x7   :  { %p683_p2 = pnand %p681_p1, %p678_p0 }
   0x9   :  { %686 = shalt.err (!%p683_p2)
}
   0xa   :  { %s687_s20 = scalar_lea.vmem %s17_s10, 128  ;;  %p692_p4 = scmp.lt.s32.totalorder %s17_s10, %s17_s10 }
   0xb   :  { %p688_p3 = scmp.ne.s32.totalorder %s17_s10, %s687_s20  ;;  %p693_p5 = scmp.lt.s32.totalorder %s687_s20, %s687_s20 }
   0xd   :  { %p694_p6 = por %p693_p5, %p692_p4 }
   0xf   :  { %p695_p7 = pnand %p694_p6, %p688_p3 }
  0x11   :  { %698 = shalt.err (!%p695_p7)
}
  0x12   :  { %19 = dma.hbm_to_vmem [thread:$0]  %s878_s0, 128, %s17_s10, [#allocation4]  }
  0x13   :  { %s699_s25 = scalar_lea.hbm %s879_s1, 1024 }
  0x14   :  { %p700_p8 = scmp.ne.s32.totalorder %s879_s1, %s699_s25  ;;  %p703_p9 = scmp.lt.u32.totalorder %s699_s25, %s879_s1 }
  0x16   :  { %p705_p10 = pnand %p703_p9, %p700_p8 }
  0x18   :  { %708 = shalt.err (!%p705_p10)
}
  0x19   :  { %s709_s30 = scalar_lea.vmem %s776_s12, 1024  ;;  %p714_p12 = scmp.lt.s32.totalorder %s776_s12, %s776_s12 }
  0x1a   :  { %p710_p11 = scmp.ne.s32.totalorder %s776_s12, %s709_s30  ;;  %p715_p13 = scmp.lt.s32.totalorder %s709_s30, %s709_s30 }
  0x1c   :  { %p716_p0 = por %p715_p13, %p714_p12 }
  0x1e   :  { %p717_p1 = pnand %p716_p0, %p710_p11 }
  0x20   :  { %720 = shalt.err (!%p717_p1)
}
  0x21   :  { %s751_s0 = smov 128   ;;  %s752_s3 = smov 8  }
  0x22   :  { %31 = dma.hbm_to_vmem [thread:$0]  %s879_s1, 1024, %s776_s12, [#allocation7], %s751_s0, %s751_s0, %s752_s3  }
  0x23   :  { %743 = dma.done.wait [#allocation4], 128  }
  0x24   :  { %744 = vsyncadd [#allocation4], 4294967168 }
  0x25   :  { %745 = dma.done.wait [#allocation7], 1024  }
  0x26   :  { %746 = vsyncadd [#allocation7], 4294966272  ;;  %v753_v0 = vmov 0.0   ;;  %vm41_vm0 = vcmask 125952   ;;  %v40_v1 = vld [vmem:[#allocation3] sm:$0xff]  ;;  %s754_s6 = smov 16  }
  0x27   :  { %39 = vst [vmem:[#allocation2] sm:$0xff] %v753_v0  ;;  %599 = vmatprep.subr.bf16.mxu0 %v753_v0  ;;  %605 = vmatprep.subr.bf16.mxu1 %v753_v0  ;;  %vm47_vm1 = vcmask 261252   ;;  %vm755_vm2 = vmmov 0   ;;  %v50_v3 = vld [vmem:[#allocation6] sm:$0xff]  ;;  %v756_v4 = vmov 125   ;;  %v757_v5 = vmov 127  }
  0x28   :  { %44 = vrot.lane.b32.xlu0 %v40_v1, %s754_s6  ;;  %42 = vst.msk [vmem:[#allocation2] sm:$0xf] %vm41_vm0, %v40_v1  ;;  %601 = vmatprep.mubr.msk.bf16.mxu0 %vm755_vm2, %v753_v0  ;;  %v758_v6 = vmov 126   ;;  %s759_s1 = smov 127   ;;  %v51_v10 = vpack.c.bf16 %v50_v3, %v50_v3  ;;  %vm60_vm3 = vcmask 130048   ;;  %v118_v12 = vld [vmem:[#allocation6 + $0x8] sm:$0xff] }
  0x29   :  { %607 = vmatprep.mubr.msk.bf16.mxu1 %vm755_vm2, %v753_v0  ;;  %659 = vset.pattern.permute.xlu1 %v756_v4  ;;  %v119_v27 = vpack.c.bf16 %v118_v12, %v118_v12  ;;  %v185_v35 = vld [vmem:[#allocation6 + $0x10] sm:$0xff]  ;;  %v252_v45 = vld [vmem:[#allocation6 + $0x18] sm:$0xff]  ;;  %vm504_vm4 = vcmask 64512   ;;  %s760_s7 = smov [#allocation8]   ;;  %vm557_vm5 = vcmask 9216  }
  0x2a   :  { %661 = vset.pattern.permute.xlu0 %v757_v5  ;;  %57 = vperm.xlu1 %659, %v50_v3   ;;  %v186_v44 = vpack.c.bf16 %v185_v35, %v185_v35  ;;  %v253_v61 = vpack.c.bf16 %v252_v45, %v252_v45  ;;  %s565_s8 = sshll.u32 %s760_s7, 4  ;;  %s566_s8 = int_to_ptr.vmem [resolvable:$true] %s565_s8 }
  0x2b   :  { %s721_s9 = scalar_lea.vmem %s566_s8, 32  ;;  %p726_p3 = scmp.lt.s32.totalorder %s566_s8, %s566_s8 }
  0x2c   :  { %p722_p2 = scmp.ne.s32.totalorder %s566_s8, %s721_s9  ;;  %p727_p4 = scmp.lt.s32.totalorder %s721_s9, %s721_s9 }
  0x2e   :  { %660 = vset.pattern.permute.xlu1 %v758_v6  ;;  %p728_p5 = por %p727_p4, %p726_p3 }
  0x2f   :  { %109 = vperm.xlu1 %660, %v50_v3  }
  0x30   :  { %p729_p6 = pnand %p728_p5, %p722_p2 }
  0x9a   :  { %v45_v2 = vpop.permute.xlu0 %44 }
  0x9b   :  { %48 = vst.msk [vmem:[#allocation2 - $0x4] sm:$0xf0] %vm47_vm1, %v45_v2 }
  0xa2   :  { %v49_v7 = vld [vmem:[#allocation2] sm:$0xff] }
  0xa3   :  { %52 = vrot.lane.b32.xlu0 %v49_v7, %s759_s1 }
  0xa7   :  { %114 = vperm.xlu0 %661, %v50_v3  }
  0xa9   :  { %v58_v11 = vpop.permute.xlu1 %57 }
  0xab   :  { %662 = vset.pattern.permute.xlu0 %v756_v4 }
  0xac   :  { %125 = vperm.xlu0 %662, %v118_v12  }
  0xae   :  { %v110_v19 = vpop.permute.xlu1 %109 }
 0x115   :  { %v53_v8 = vpop.permute.xlu0 %52 }
 0x116   :  { %v54_v9 = vpack.c.bf16 %v53_v8, %v49_v7 }
 0x118   :  { %600 = vmatpush3.bf16.msra.mxu0 %v54_v9 }
 0x119   :  { %611 = vmatprep.subr.bf16.mxu0 %v753_v0 }
 0x11b   :  { %602 = vmatmul.mubr.msk.bf16.vlgmr.msra.gmra.mrb[0].mxu0 %vm60_vm3, %v51_v10 }
 0x11c   :  { %613 = vmatprep.mubr.msk.bf16.mxu0 %vm755_vm2, %v753_v0 }
 0x126   :  { %v115_v22 = vpop.permute.xlu0 %114 }
 0x12b   :  { %v126_v28 = vpop.permute.xlu0 %125 }
 0x1ee   :  { %v98_v13 = vpop.f32.mrb[0].mxu0 }
 0x1ef   :  { %v99_v14 = vadd.f32 %v98_v13, %v58_v11  ;;  %v603_v15 = vpop.f32.mrb[1].mxu0 }
 0x1f0   :  { %v101_v16 = vpop.f32.mrb[2].mxu0 }
 0x1f1   :  { %v104_v17 = vmax.f32 %v99_v14, 0.0  ;;  %v604_v18 = vpop.f32.mrb[3].mxu0 }
 0x1f3   :  { %105 = vrot.lane.b32.xlu1 %v104_v17, %s759_s1 }
 0x265   :  { %v106_v20 = vpop.permute.xlu1 %105 }
 0x266   :  { %v107_v21 = vmax.f32 %v104_v17, %v106_v20 }
 0x268   :  { %v112_v23 = vmul.f32 %v110_v19, %v107_v21 }
 0x26a   :  { %v117_v24 = vadd.f32 %v115_v22, %v112_v23 }
 0x26c   :  { %120 = vrot.lane.b32.xlu1 %v117_v24, %s759_s1 }
 0x270   :  { %176 = vperm.xlu1 %660, %v118_v12  }
 0x274   :  { %663 = vset.pattern.permute.xlu1 %v757_v5 }
 0x275   :  { %181 = vperm.xlu1 %663, %v118_v12  }
 0x279   :  { %664 = vset.pattern.permute.xlu1 %v758_v6 }
 0x2de   :  { %v121_v25 = vpop.permute.xlu1 %120 }
 0x2df   :  { %v122_v26 = vpack.c.bf16 %v121_v25, %v117_v24 }
 0x2e1   :  { %606 = vmatpush3.bf16.msra.mxu1 %v122_v26 }
 0x2e2   :  { %617 = vmatprep.subr.bf16.mxu1 %v753_v0 }
 0x2e4   :  { %608 = vmatmul.mubr.msk.bf16.vlgmr.msra.gmra.mrb[0].mxu1 %vm60_vm3, %v119_v27 }
 0x2e5   :  { %619 = vmatprep.mubr.msk.bf16.mxu1 %vm755_vm2, %v753_v0 }
 0x2ef   :  { %v177_v36 = vpop.permute.xlu1 %176 }
 0x2f4   :  { %v182_v39 = vpop.permute.xlu1 %181 }
 0x3b7   :  { %v165_v29 = vpop.f32.mrb[0].mxu1 }
 0x3b8   :  { %v166_v30 = vadd.f32 %v165_v29, %v126_v28  ;;  %v609_v31 = vpop.f32.mrb[1].mxu1 }
 0x3b9   :  { %v168_v32 = vpop.f32.mrb[2].mxu1 }
 0x3ba   :  { %v171_v33 = vmax.f32 %v166_v30, 0.0  ;;  %v610_v34 = vpop.f32.mrb[3].mxu1 }
 0x3bc   :  { %172 = vrot.lane.b32.xlu0 %v171_v33, %s759_s1 }
 0x3c0   :  { %192 = vperm.xlu0 %662, %v185_v35  }
 0x3c4   :  { %665 = vset.pattern.permute.xlu0 %v757_v5 }
 0x3c5   :  { %248 = vperm.xlu0 %665, %v185_v35  }
 0x3c9   :  { %666 = vset.pattern.permute.xlu0 %v756_v4 }
 0x3ca   :  { %259 = vperm.xlu0 %666, %v252_v45  }
 0x42e   :  { %v173_v37 = vpop.permute.xlu0 %172 }
 0x42f   :  { %v174_v38 = vmax.f32 %v171_v33, %v173_v37 }
 0x431   :  { %v179_v40 = vmul.f32 %v177_v36, %v174_v38 }
 0x433   :  { %v184_v41 = vadd.f32 %v182_v39, %v179_v40 }
 0x435   :  { %187 = vrot.lane.b32.xlu1 %v184_v41, %s759_s1 }
 0x439   :  { %243 = vperm.xlu1 %664, %v185_v35  }
 0x43f   :  { %v193_v46 = vpop.permute.xlu0 %192 }
 0x444   :  { %v249_v56 = vpop.permute.xlu0 %248 }
 0x449   :  { %v260_v62 = vpop.permute.xlu0 %259 }
 0x4a7   :  { %v188_v42 = vpop.permute.xlu1 %187 }
 0x4a8   :  { %v189_v43 = vpack.c.bf16 %v188_v42, %v184_v41 }
 0x4aa   :  { %612 = vmatpush3.bf16.msra.mxu0 %v189_v43 }
 0x4ab   :  { %623 = vmatprep.subr.bf16.mxu0 %v753_v0 }
 0x4ad   :  { %614 = vmatmul.mubr.msk.bf16.vlgmr.msra.gmra.mrb[4].mxu0 %vm60_vm3, %v186_v44 }
 0x4ae   :  { %625 = vmatprep.mubr.msk.bf16.mxu0 %vm755_vm2, %v753_v0 }
 0x4b8   :  { %v244_v53 = vpop.permute.xlu1 %243 }
 0x580   :  { %v232_v47 = vpop.f32.mrb[4].mxu0 }
 0x581   :  { %v233_v48 = vadd.f32 %v232_v47, %v193_v46  ;;  %v615_v49 = vpop.f32.mrb[5].mxu0 }
 0x582   :  { %v235_v50 = vpop.f32.mrb[6].mxu0  ;;  %v453_v49 = vld [vmem:[#allocation6 + $0x30] sm:$0x3] }
 0x583   :  { %v238_v51 = vmax.f32 %v233_v48, 0.0  ;;  %v616_v52 = vpop.f32.mrb[7].mxu0  ;;  %v456_v50 = vpack.c.bf16 %v453_v49, %v453_v49 }
 0x585   :  { %239 = vrot.lane.b32.xlu1 %v238_v51, %s759_s1 }
 0x5f7   :  { %v240_v54 = vpop.permute.xlu1 %239 }
 0x5f8   :  { %v241_v55 = vmax.f32 %v238_v51, %v240_v54 }
 0x5fa   :  { %v246_v57 = vmul.f32 %v244_v53, %v241_v55 }
 0x5fc   :  { %v251_v58 = vadd.f32 %v249_v56, %v246_v57  ;;  %v581_v56 = vld [vmem:[#allocation6 + $0x3a] ss:$0 sm:$0xff] }
 0x5fe   :  { %254 = vrot.lane.b32.xlu1 %v251_v58, %s759_s1 }
 0x602   :  { %310 = vperm.xlu1 %664, %v252_v45  }
 0x606   :  { %667 = vset.pattern.permute.xlu1 %v757_v5 }
 0x607   :  { %315 = vperm.xlu1 %667, %v252_v45  }
 0x60b   :  { %668 = vset.pattern.permute.xlu1 %v758_v6  ;;  %v319_v6 = vld [vmem:[#allocation6 + $0x20] sm:$0xff] }
 0x60c   :  { %v320_v17 = vpack.c.bf16 %v319_v6, %v319_v6 }
 0x670   :  { %v255_v59 = vpop.permute.xlu1 %254 }
 0x671   :  { %v256_v60 = vpack.c.bf16 %v255_v59, %v251_v58 }
 0x673   :  { %618 = vmatpush3.bf16.msra.mxu1 %v256_v60 }
 0x674   :  { %629 = vmatprep.subr.bf16.mxu1 %v753_v0 }
 0x676   :  { %620 = vmatmul.mubr.msk.bf16.vlgmr.msra.gmra.mrb[4].mxu1 %vm60_vm3, %v253_v61 }
 0x677   :  { %631 = vmatprep.mubr.msk.bf16.mxu1 %vm755_vm2, %v753_v0 }
 0x681   :  { %v311_v9 = vpop.permute.xlu1 %310 }
 0x686   :  { %v316_v12 = vpop.permute.xlu1 %315 }
 0x749   :  { %v299_v63 = vpop.f32.mrb[4].mxu1 }
 0x74a   :  { %v300_v1 = vadd.f32 %v299_v63, %v260_v62  ;;  %v621_v2 = vpop.f32.mrb[5].mxu1 }
 0x74b   :  { %v302_v3 = vpop.f32.mrb[6].mxu1 }
 0x74c   :  { %v305_v7 = vmax.f32 %v300_v1, 0.0  ;;  %v622_v8 = vpop.f32.mrb[7].mxu1 }
 0x74e   :  { %306 = vrot.lane.b32.xlu0 %v305_v7, %s759_s1 }
 0x752   :  { %326 = vperm.xlu0 %666, %v319_v6  }
 0x756   :  { %669 = vset.pattern.permute.xlu0 %v757_v5 }
 0x757   :  { %382 = vperm.xlu0 %669, %v319_v6  }
 0x75b   :  { %670 = vset.pattern.permute.xlu0 %v756_v4  ;;  %v386_v4 = vld [vmem:[#allocation6 + $0x28] sm:$0xff] }
 0x75c   :  { %393 = vperm.xlu0 %670, %v386_v4   ;;  %v387_v33 = vpack.c.bf16 %v386_v4, %v386_v4 }
 0x760   :  { %672 = vset.pattern.permute.xlu0 %v757_v5 }
 0x7c0   :  { %v307_v10 = vpop.permute.xlu0 %306 }
 0x7c1   :  { %v308_v11 = vmax.f32 %v305_v7, %v307_v10 }
 0x7c3   :  { %v313_v13 = vmul.f32 %v311_v9, %v308_v11 }
 0x7c5   :  { %v318_v14 = vadd.f32 %v316_v12, %v313_v13 }
 0x7c7   :  { %321 = vrot.lane.b32.xlu1 %v318_v14, %s759_s1 }
 0x7cb   :  { %377 = vperm.xlu1 %668, %v319_v6  }
 0x7d1   :  { %v327_v18 = vpop.permute.xlu0 %326 }
 0x7d6   :  { %v383_v28 = vpop.permute.xlu0 %382 }
 0x7db   :  { %v394_v34 = vpop.permute.xlu0 %393 }
 0x839   :  { %v322_v15 = vpop.permute.xlu1 %321 }
 0x83a   :  { %v323_v16 = vpack.c.bf16 %v322_v15, %v318_v14 }
 0x83c   :  { %624 = vmatpush3.bf16.msra.mxu0 %v323_v16 }
 0x83d   :  { %635 = vmatprep.subr.bf16.mxu0 %v753_v0 }
 0x83f   :  { %626 = vmatmul.mubr.msk.bf16.vlgmr.msra.gmra.mrb[8].mxu0 %vm60_vm3, %v320_v17 }
 0x840   :  { %637 = vmatprep.mubr.msk.bf16.mxu0 %vm755_vm2, %v753_v0 }
 0x84a   :  { %v378_v25 = vpop.permute.xlu1 %377 }
 0x912   :  { %v366_v19 = vpop.f32.mrb[8].mxu0 }
 0x913   :  { %v367_v20 = vadd.f32 %v366_v19, %v327_v18  ;;  %v627_v21 = vpop.f32.mrb[9].mxu0 }
 0x914   :  { %v369_v22 = vpop.f32.mrb[10].mxu0 }
 0x915   :  { %v372_v23 = vmax.f32 %v367_v20, 0.0  ;;  %v628_v24 = vpop.f32.mrb[11].mxu0 }
 0x917   :  { %373 = vrot.lane.b32.xlu1 %v372_v23, %s759_s1 }
 0x989   :  { %v374_v26 = vpop.permute.xlu1 %373 }
 0x98a   :  { %v375_v27 = vmax.f32 %v372_v23, %v374_v26 }
 0x98c   :  { %v380_v29 = vmul.f32 %v378_v25, %v375_v27 }
 0x98e   :  { %v385_v30 = vadd.f32 %v383_v28, %v380_v29 }
 0x990   :  { %388 = vrot.lane.b32.xlu1 %v385_v30, %s759_s1 }
 0x994   :  { %444 = vperm.xlu1 %668, %v386_v4  }
 0x998   :  { %671 = vset.pattern.permute.xlu1 %v757_v5  ;;  %v454_v5 = vld [vmem:[#allocation6 + $0x38] sm:$0x3] }
 0x999   :  { %449 = vperm.xlu1 %671, %v386_v4   ;;  %v499_v41 = vpack.c.bf16 %v454_v5, %v454_v5 }
 0x99b   :  { %v509_v42 = vsel %vm504_vm4, %v499_v41, 0 }
 0xa02   :  { %v389_v31 = vpop.permute.xlu1 %388 }
 0xa03   :  { %v390_v32 = vpack.c.bf16 %v389_v31, %v385_v30 }
 0xa05   :  { %630 = vmatpush3.bf16.msra.mxu1 %v390_v32 }
 0xa06   :  { %641 = vmatprep.subr.bf16.mxu1 %v753_v0 }
 0xa08   :  { %632 = vmatmul.mubr.msk.bf16.vlgmr.msra.gmra.mrb[8].mxu1 %vm60_vm3, %v387_v33 }
 0xa09   :  { %643 = vmatprep.mubr.msk.bf16.mxu1 %vm755_vm2, %v753_v0 }
 0xa0e   :  { %642 = vmatpush3.bf16.xpose.msra.mxu1 %v509_v42 }
 0xa13   :  { %v445_v43 = vpop.permute.xlu1 %444 }
 0xa18   :  { %v450_v46 = vpop.permute.xlu1 %449 }
 0xadb   :  { %v433_v35 = vpop.f32.mrb[8].mxu1 }
 0xadc   :  { %v434_v36 = vadd.f32 %v433_v35, %v394_v34  ;;  %v633_v37 = vpop.f32.mrb[9].mxu1 }
 0xadd   :  { %v436_v38 = vpop.f32.mrb[10].mxu1 }
 0xade   :  { %v439_v39 = vmax.f32 %v434_v36, 0.0  ;;  %v634_v40 = vpop.f32.mrb[11].mxu1 }
 0xae0   :  { %440 = vrot.lane.b32.xlu0 %v439_v39, %s759_s1 }
 0xb52   :  { %v441_v44 = vpop.permute.xlu0 %440 }
 0xb53   :  { %v442_v45 = vmax.f32 %v439_v39, %v441_v44 }
 0xb55   :  { %v447_v0 = vmul.f32 %v445_v43, %v442_v45 }
 0xb57   :  { %v452_v47 = vadd.f32 %v450_v46, %v447_v0 }
 0xb59   :  { %v457_v48 = vpack.c.bf16 %v452_v47, %v452_v47 }
 0xb5b   :  { %636 = vmatpush3.bf16.xpose.msra.mxu0 %v457_v48 }
 0xb62   :  { %638 = vmatmul.mubr.bf16.vlgmr.msra.gmra.mrb[12].mxu0 %v456_v50 }
 0xc35   :  { %v492_v51 = vpop.f32.mrb[12].mxu0 }
 0xc36   :  { %v498_v52 = vpack.c.bf16 %v492_v51, %v492_v51  ;;  %v639_v53 = vpop.f32.mrb[13].mxu0 }
 0xc37   :  { %v495_v54 = vpop.f32.mrb[14].mxu0 }
 0xc38   :  { %v640_v55 = vpop.f32.mrb[15].mxu0  ;;  %644 = vmatmul.mubr.msk.bf16.vlgmr.msra.gmra.mrb[12].mxu1 %vm504_vm4, %v498_v52 }
 0xd0b   :  { %v545_v57 = vpop.f32.mrb[12].mxu1 }
 0xd0c   :  { %v546_v58 = vadd.f32 %v581_v56, %v545_v57  ;;  %v645_v59 = vpop.f32.mrb[13].mxu1 }
 0xd0d   :  { %v548_v60 = vpop.f32.mrb[14].mxu1 }
 0xd0e   :  { %v551_v61 = vsub.f32 0.0, %v546_v58  ;;  %v646_v62 = vpop.f32.mrb[15].mxu1 }
 0xd10   :  { %v552_v63 = vmul.f32 1.442695, %v551_v61 }
 0xd12   :  { %673 = vpow2.f32 %v552_v63 }
 0xd1c   :  { %v674_v1 = vpop.eup %673 }
 0xd1d   :  { %v554_v2 = vadd.f32 1.0, %v674_v1 }
 0xd1f   :  { %675 = vrcp.f32 %v554_v2 }
 0xd29   :  { %v676_v3 = vpop.eup %675 }
 0xd2a   :  { %558 = vst.msk [vmem:[#allocation8] sm:$0x3] %vm557_vm5, %v676_v3 }
 0xd2b   :  { %732 = shalt.err (!%p729_p6)
}
 0xd2c   :  { %s733_s12 = scalar_lea.hbm %s880_s2, 32 }
 0xd2d   :  { %p734_p7 = scmp.ne.s32.totalorder %s880_s2, %s733_s12  ;;  %p737_p8 = scmp.lt.u32.totalorder %s733_s12, %s880_s2 }
 0xd2f   :  { %p739_p9 = pnand %p737_p8, %p734_p7 }
 0xd31   :  { %742 = shalt.err (!%p739_p9)
}
 0xd32   :  { %568 = dma.vmem_to_hbm [thread:$0]  %s566_s8, 32, %s880_s2, [#allocation5]  }
 0xd33   :  { %747 = dma.done.wait [#allocation5], 32  }
 0xd34   :  { %748 = vsyncadd [#allocation5], 4294967264 }
 0xd35   :  { %572 = vsyncpa [#allocation4], 1 }
 0xd36   :  { %573 = vsyncpa [#allocation7], 1 }
 0xd37   :  { %574 = vsyncpa [#allocation5], 1 }

</bundles_post_ra>
